<compile_context>
chip_gen: v7x
topology: tpu7x:2x2x1
jax: 0.10.0
libtpu: 0.0.40
codegen_flags: <defaults>
</compile_context>

<pallas_src>
import functools

import jax
import jax.numpy as jnp
from jax.experimental import pallas as pl
from jax.experimental.pallas import tpu as pltpu


# ---------------------------------------------------------------------------
# Tunables
# ---------------------------------------------------------------------------
_SMALL_N = 1024        # <= one f32 vreg: skip Pallas, let XLA fuse the math.
_TILE_C = 512          # lane-dense column count (multiple of 128).
_MAX_TILE_R = 512      # max rows per block: 512x512 f32 = 1 MiB per buffer.


def _round_up(x, m):
    return -(-x // m) * m


class BudgetConstraint:
    """JAX/Pallas re-implementation of cvpods BudgetConstraint (forward only)."""

    def __init__(self, loss_weight, loss_mu, flops_all, warm_up):
        self.loss_weight = float(loss_weight)
        self.loss_mu = float(loss_mu)
        self.flops_all = float(flops_all)
        self.warm_up = bool(warm_up)

        inv_flops_all = 1.0 / self.flops_all   # config-static -> baked constant
        loss_mu_c = self.loss_mu               # config-static -> baked constant

        def kernel(scale_ref, x_ref, o_ref):
            # scale_ref: SMEM f32[1] = loss_weight * warm_up_rate (dynamic)
            # divide replaced by a baked reciprocal multiply; mu is an immediate.
            d = x_ref[...] * inv_flops_all - loss_mu_c
            o_ref[...] = scale_ref[0] * (d * d)

        self._kernel = kernel

    # -- dynamic scalar: works for Python floats and traced values -----------
    def _scale(self, warm_up_rate):
        if self.warm_up:
            wur = jnp.minimum(jnp.float32(1.0),
                              jnp.asarray(warm_up_rate, dtype=jnp.float32))
        else:
            wur = jnp.float32(1.0)
        return jnp.float32(self.loss_weight) * wur

    # -- large-tensor path: lane-dense tiled Pallas kernel --------------------
    def _pallas_path(self, x, scale):
        orig_shape = x.shape
        n = x.size
        flat = x.reshape(-1)

        cols = _TILE_C
        rows = -(-n // cols)
        block_r = min(_MAX_TILE_R, _round_up(rows, 8))
        rows_padded = _round_up(rows, block_r)

        pad = rows_padded * cols - n
        if pad:
            flat = jnp.concatenate([flat, jnp.zeros((pad,), jnp.float32)])
        x2d = flat.reshape(rows_padded, cols)

        grid = (rows_padded // block_r,)
        out = pl.pallas_call(
            self._kernel,
            out_shape=jax.ShapeDtypeStruct((rows_padded, cols), jnp.float32),
            grid=grid,
            in_specs=[
                pl.BlockSpec(memory_space=pltpu.MemorySpace.SMEM),   # scale f32[1]
                pl.BlockSpec((block_r, cols), lambda i: (i, 0)),     # flops tile
            ],
            out_specs=pl.BlockSpec((block_r, cols), lambda i: (i, 0)),
            compiler_params=pltpu.CompilerParams(
                dimension_semantics=("parallel",),   # shards across TCs on v7x
            ),
        )(scale.reshape(1), x2d)

        return out.reshape(-1)[:n].reshape(orig_shape)

    def __call__(self, flops_expt, warm_up_rate=1.0):
        x = jnp.asarray(flops_expt, dtype=jnp.float32)
        scale = self._scale(warm_up_rate)

        if x.size <= _SMALL_N:
            # Scalar / tiny inputs: a pallas_call here would be 100% launch and
            # DMA overhead; the fused XLA expression is strictly faster.
            d = x * (1.0 / self.flops_all) - self.loss_mu
            return scale * d * d

        return self._pallas_path(x, scale)


if __name__ == "__main__":
    key = jax.random.PRNGKey(0)

    # Deterministic "config" values (cfg.MODEL.BUDGET.*).
    loss_weight = 0.5
    loss_mu = 0.3
    flops_all = 1.0e9
    warm_up = True

    module = BudgetConstraint(loss_weight, loss_mu, flops_all, warm_up)

    # Scalar expected-FLOPs (the typical use) and a small batch -> fast jnp path.
    k0, k1, k2, k3 = jax.random.split(key, 4)
    flops_scalar = jax.random.uniform(k0, (), jnp.float32) * flops_all
    flops_batch = jax.random.uniform(k1, (2, 8), jnp.float32) * flops_all

    # Larger tensors -> exercise the Pallas kernel (incl. the padding path).
    flops_large = jax.random.uniform(k2, (4, 1024), jnp.float32) * flops_all
    flops_ragged = jax.random.uniform(k3, (3, 700), jnp.float32) * flops_all

    out_scalar = jax.block_until_ready(module(flops_scalar, warm_up_rate=0.7))
    out_batch = jax.block_until_ready(module(flops_batch, warm_up_rate=1.5))
    out_large = jax.block_until_ready(module(flops_large, warm_up_rate=0.7))
    out_ragged = jax.block_until_ready(module(flops_ragged, warm_up_rate=1.5))

    # Pure-JAX reference.
    def ref(x, wur):
        w = min(1.0, wur) if warm_up else 1.0
        return loss_weight * w * (x / flops_all - loss_mu) ** 2

    assert jnp.allclose(out_scalar, ref(flops_scalar, 0.7), rtol=1e-5, atol=1e-6)
    assert jnp.allclose(out_batch, ref(flops_batch, 1.5), rtol=1e-5, atol=1e-6)
    assert jnp.allclose(out_large, ref(flops_large, 0.7), rtol=1e-5, atol=1e-6)
    assert jnp.allclose(out_ragged, ref(flops_ragged, 1.5), rtol=1e-5, atol=1e-6)
    assert out_large.shape == flops_large.shape
    assert out_ragged.shape == flops_ragged.shape

    print("KERNEL_OK")
</pallas_src>

<mosaic_0001>
module attributes {stable_mosaic.version = 11 : i64} {
  func.func @kernel(%arg0: i32, %arg1: memref<1xf32, #tpu.memory_space<smem>>, %arg2: memref<8x512xf32, #tpu.memory_space<vmem>>, %arg3: memref<8x512xf32, #tpu.memory_space<vmem>>) attributes {dimension_semantics = [#tpu.dimension_semantics<parallel>], iteration_bounds = array<i64: 1>, scalar_prefetch = 0 : i64, scratch_operands = 0 : i64, tpu.core_type = #tpu.core_type<tc>, window_params = [{transform_indices = @transform_0, window_bounds = array<i64: 1>}, {transform_indices = @transform_1, window_bounds = array<i64: 8, 512>}, {transform_indices = @transform_2, window_bounds = array<i64: 8, 512>}]} {
    %c0 = arith.constant 0 : index
    %c0_0 = arith.constant 0 : index
    %0 = vector.load %arg2[%c0, %c0_0] : memref<8x512xf32, #tpu.memory_space<vmem>>, vector<8x512xf32>
    %cst = arith.constant 9.99999971E-10 : f32
    %1 = vector.broadcast %cst : f32 to vector<8x512xf32>
    %2 = arith.mulf %0, %1 : vector<8x512xf32>
    %cst_1 = arith.constant 3.000000e-01 : f32
    %3 = vector.broadcast %cst_1 : f32 to vector<8x512xf32>
    %4 = arith.subf %2, %3 : vector<8x512xf32>
    %c0_2 = arith.constant 0 : index
    %5 = memref.load %arg1[%c0_2] : memref<1xf32, #tpu.memory_space<smem>>
    %6 = arith.mulf %4, %4 : vector<8x512xf32>
    %7 = vector.broadcast %5 : f32 to vector<8x512xf32>
    %8 = arith.mulf %7, %6 : vector<8x512xf32>
    %c0_3 = arith.constant 0 : index
    %c0_4 = arith.constant 0 : index
    %9 = vector.load %arg3[%c0_3, %c0_4] : memref<8x512xf32, #tpu.memory_space<vmem>>, vector<8x512xf32>
    tpu.vector_store %arg3[%c0_3, %c0_4], %8 {strides = array<i32>} : memref<8x512xf32, #tpu.memory_space<vmem>>, vector<8x512xf32>,
    return
  }
  func.func @transform_0(%arg0: i32) -> i32 {
    %c0_i32 = arith.constant 0 : i32
    %c0_i32_0 = arith.constant 0 : i32
    return %c0_i32 : i32
  }
  func.func @transform_1(%arg0: i32) -> (i32, i32) {
    %c0_i32 = arith.constant 0 : i32
    %c0_i32_0 = arith.constant 0 : i32
    return %arg0, %c0_i32 : i32, i32
  }
  func.func @transform_2(%arg0: i32) -> (i32, i32) {
    %c0_i32 = arith.constant 0 : i32
    %c0_i32_0 = arith.constant 0 : i32
    return %arg0, %c0_i32 : i32, i32
  }
}

</mosaic_0001>

<bundles_post_ra>
// kernel: tpu_custom_call.1
= control target key start
LH: loop header
LB: loop body
LE: loop exit
PB: predicated region body
PF: predicated region fallthrough
CT: control target
= control target key end

     0   :  { %8 = vsyncpa [#allocation4], 0  ;;  %s164_s0 = inlined_call_operand.<no memory space> [shape: f32[1], index: 0, kind: input, shape index: {}]   ;;  %s165_s1 = inlined_call_operand.hbm [shape: f32[8,512], index: 1, kind: input, shape index: {}]   ;;  %s166_s2 = inlined_call_operand.hbm [shape: f32[8,512], index: 2, kind: output, shape index: {}]  }
   0x1   :  { %9 = vsyncpa [#allocation5], 0  ;;  %s120_s9 = smov [#allocation3]   ;;  %s72_s13 = scalar_lea.hbm %s165_s1, 512 }
   0x2   :  { %s18_s10 = sshll.u32 %s120_s9, 4  ;;  %p73_p0 = scmp.ne.s32.totalorder %s165_s1, %s72_s13  ;;  %s19_s10 = int_to_ptr.vmem [resolvable:$true] %s18_s10 }
   0x3   :  { %p76_p1 = scmp.lt.u32.totalorder %s72_s13, %s165_s1 }
   0x5   :  { %p78_p2 = pnand %p76_p1, %p73_p0 }
   0x7   :  { %81 = shalt.err (!%p78_p2)
}
   0x8   :  { %s82_s18 = scalar_lea.vmem %s19_s10, 512  ;;  %p87_p4 = scmp.lt.s32.totalorder %s19_s10, %s19_s10 }
   0x9   :  { %p83_p3 = scmp.ne.s32.totalorder %s19_s10, %s82_s18  ;;  %p88_p5 = scmp.lt.s32.totalorder %s82_s18, %s82_s18 }
   0xb   :  { %p89_p6 = por %p88_p5, %p87_p4 }
   0xd   :  { %p90_p7 = pnand %p89_p6, %p83_p3 }
   0xf   :  { %93 = shalt.err (!%p90_p7)
}
  0x10   :  { %21 = dma.hbm_to_vmem [thread:$0]  %s165_s1, 512, %s19_s10, [#allocation4]  }
  0x11   :  { %116 = dma.done.wait [#allocation4], 512  }
  0x12   :  { %117 = vsyncadd [#allocation4], 4294966784  ;;  %v25_v0 = vld [vmem:[#allocation3] sm:$0xff]  ;;  %v26_v1 = vld [vmem:[#allocation3 + $0x8] sm:$0xff]  ;;  %v42_v10 = vstv %s164_s0  ;;  %s121_s1 = smov [#allocation6]  }
  0x13   :  { %v27_v2 = vld [vmem:[#allocation3 + $0x10] sm:$0xff]  ;;  %v29_v3 = vmul.f32 1e-09, %v25_v0  ;;  %v30_v4 = vmul.f32 1e-09, %v26_v1  ;;  %v28_v6 = vld [vmem:[#allocation3 + $0x18] sm:$0xff] }
  0x14   :  { %v31_v5 = vmul.f32 1e-09, %v27_v2  ;;  %v32_v11 = vmul.f32 1e-09, %v28_v6  ;;  %s57_s23 = sshll.u32 %s121_s1, 4  ;;  %s58_s23 = int_to_ptr.vmem [resolvable:$true] %s57_s23 }
  0x15   :  { %v66_v7 = vadd.f32 -0.3, %v29_v3  ;;  %v67_v8 = vadd.f32 -0.3, %v30_v4  ;;  %s94_s24 = scalar_lea.vmem %s58_s23, 512  ;;  %p99_p9 = scmp.lt.s32.totalorder %s58_s23, %s58_s23 }
  0x16   :  { %v68_v9 = vadd.f32 -0.3, %v31_v5  ;;  %v69_v15 = vadd.f32 -0.3, %v32_v11  ;;  %p95_p8 = scmp.ne.s32.totalorder %s58_s23, %s94_s24  ;;  %p100_p10 = scmp.lt.s32.totalorder %s94_s24, %s94_s24 }
  0x17   :  { %v38_v12 = vmul.f32 %v66_v7, %v66_v7  ;;  %v39_v13 = vmul.f32 %v67_v8, %v67_v8 }
  0x18   :  { %v40_v14 = vmul.f32 %v68_v9, %v68_v9  ;;  %v41_v19 = vmul.f32 %v69_v15, %v69_v15  ;;  %p101_p11 = por %p100_p10, %p99_p9 }
  0x19   :  { %v43_v16 = vmul.f32 %v42_v10, %v38_v12  ;;  %v44_v17 = vmul.f32 %v42_v10, %v39_v13 }
  0x1a   :  { %v45_v18 = vmul.f32 %v42_v10, %v40_v14  ;;  %v46_v20 = vmul.f32 %v42_v10, %v41_v19  ;;  %p102_p12 = pnand %p101_p11, %p95_p8 }
  0x1b   :  { %47 = vst [vmem:[#allocation6] sm:$0xff] %v43_v16  ;;  %48 = vst [vmem:[#allocation6 + $0x8] sm:$0xff] %v44_v17 }
  0x1c   :  { %49 = vst [vmem:[#allocation6 + $0x10] sm:$0xff] %v45_v18  ;;  %50 = vst [vmem:[#allocation6 + $0x18] sm:$0xff] %v46_v20 }
  0x1d   :  { %105 = shalt.err (!%p102_p12)
}
  0x1e   :  { %s106_s26 = scalar_lea.hbm %s166_s2, 512 }
  0x1f   :  { %p107_p13 = scmp.ne.s32.totalorder %s166_s2, %s106_s26  ;;  %p110_p0 = scmp.lt.u32.totalorder %s106_s26, %s166_s2 }
  0x21   :  { %p112_p1 = pnand %p110_p0, %p107_p13 }
  0x23   :  { %115 = shalt.err (!%p112_p1)
}
  0x24   :  { %60 = dma.vmem_to_hbm [thread:$0]  %s58_s23, 512, %s166_s2, [#allocation5]  }
  0x25   :  { %118 = dma.done.wait [#allocation5], 512  }
  0x26   :  { %119 = vsyncadd [#allocation5], 4294966784 }
  0x27   :  { %64 = vsyncpa [#allocation4], 1 }
  0x28   :  { %65 = vsyncpa [#allocation5], 1 }

</bundles_post_ra>
